<compile_context>
chip_gen: v7x
topology: tpu7x:2x2x1
jax: 0.10.0
libtpu: 0.0.40
codegen_flags: <defaults>
</compile_context>

<pallas_src>
from functools import partial

import numpy as np
import jax
import jax.numpy as jnp
from jax import lax
from jax.experimental import pallas as pl
from jax.experimental.pallas import tpu as pltpu

EPS = 1e-5  # PyTorch BatchNorm2d default


def _round_up(x, m):
    return (x + m - 1) // m * m


# ----------------------------------------------------------------------------
# Host-side constants (numpy, built at trace time -> baked-in constants).
# ----------------------------------------------------------------------------
def _interp_matrix_np(n_out, n_in):
    """Rows of bilinear align_corners=True interpolation weights."""
    if n_in == 1:
        return np.ones((n_out, 1), np.float32)
    src = np.arange(n_out) * (n_in - 1) / (n_out - 1)
    lo = np.clip(np.floor(src).astype(np.int64), 0, n_in - 2)
    frac = (src - lo).astype(np.float32)
    m = np.zeros((n_out, n_in), np.float32)
    m[np.arange(n_out), lo] += 1.0 - frac
    m[np.arange(n_out), lo + 1] += frac
    return m


def _upsample_pad_matrix_np(H1, W1, H2, W2):
    """(H1*W1, H2*W2) matrix: bilinear 2x upsample (align_corners) + F.pad.

    Faithful to the module's quirk: x_diff (computed from H sizes) pads the W
    axis and y_diff (from W sizes) pads the H axis.
    """
    Ho, Wo = 2 * H1, 2 * W1
    A = _interp_matrix_np(Ho, H1)           # (Ho, H1)
    B = _interp_matrix_np(Wo, W1)           # (Wo, W1)
    U = np.kron(A, B)                       # (Ho*Wo, H1*W1)
    x_diff, y_diff = H2 - Ho, W2 - Wo
    pt, plft = y_diff // 2, x_diff // 2
    M = np.zeros((H1 * W1, H2, W2), np.float32)
    M[:, pt:pt + Ho, plft:plft + Wo] = U.T.reshape(H1 * W1, Ho, Wo)
    return M.reshape(H1 * W1, H2 * W2)


def _boundary_masks_np(H, W):
    """(9, H*W) per-tap validity masks replacing the padding=1 conv halo."""
    q = np.arange(H * W)
    yy, xx = q // W, q % W
    masks = np.empty((9, H * W), np.float32)
    for t in range(9):
        dy, dx = t // 3 - 1, t % 3 - 1
        masks[t] = ((yy + dy >= 0) & (yy + dy < H) &
                    (xx + dx >= 0) & (xx + dx < W)).astype(np.float32)
    return masks


def _fold_conv(block, cin_pad, cout_pad):
    """Fold eval-mode BN + bias into the conv weights; lane-dense layout.

    Returns w: (cout_pad, 9*cin_pad) with row order = output channel and column
    order = (tap major, input channel minor); pad rows/cols are zero.
    And s: (cout_pad, 1) folded shift.
    """
    w, b, scale, shift = block["w"], block["b"], block["scale"], block["shift"]
    kh, kw, cin, cout = w.shape
    wf = (w * scale).astype(jnp.float32).reshape(kh * kw, cin, cout)  # (9,ci,co)
    wf = jnp.transpose(wf, (2, 0, 1))                                 # (co,9,ci)
    wf = jnp.pad(wf, ((0, cout_pad - cout), (0, 0), (0, cin_pad - cin)))
    wk = wf.reshape(cout_pad, kh * kw * cin_pad)
    sf = (b * scale + shift).reshape(cout, 1).astype(jnp.float32)
    sf = jnp.pad(sf, ((0, cout_pad - cout), (0, 0)))
    return wk, sf


# ----------------------------------------------------------------------------
# Pallas kernel: upsample(x1) + concat + DoubleConv, fully fused.
# ----------------------------------------------------------------------------
def _up_doubleconv_kernel(x2_ref, x1_ref, up_ref, mask_ref,
                          w1_ref, w2_ref, s1_ref, s2_ref, o_ref, *, G, H, W):
    # x2_ref  : (G, CP, HW)    skip connection, channels in rows [0,C2), rest 0
    # x1_ref  : (G, CP, HW1)   low-res input, channels in rows [C2,C2+C1), rest 0
    # up_ref  : (HW1, HW)      bilinear-upsample + pad matrix (constant)
    # mask_ref: (9, G*HW)      per-tap boundary masks (constant, tiled over G)
    # w1_ref  : (CM, 9*CP)     conv1 weights (BN folded, lane-dense)
    # w2_ref  : (Cout, 9*CM)   conv2 weights
    # s1_ref  : (CM, 1)        conv1 folded shift
    # s2_ref  : (Cout, 1)      conv2 folded shift
    # o_ref   : (G, Cout, HW)  output (flattened NCHW, lane-dense)
    HW = H * W
    L = G * HW

    def merge_lanes(cols):                       # lane-concat (aligned: HW%128==0)
        return cols[0] if len(cols) == 1 else jnp.concatenate(cols, axis=1)

    # Conv1 input = concat([x2, upsample(x1)], channel).  x1 channels were
    # pre-placed at rows [C2, C2+C1) by the wrapper, so the channel concat is a
    # plain elementwise add of two aligned CP-row blocks.
    up = up_ref[...]
    x2m = merge_lanes([x2_ref[n] for n in range(G)])                 # (CP, L)
    x1m = merge_lanes([jnp.dot(x1_ref[n], up,
                               preferred_element_type=jnp.float32)
                       for n in range(G)])                           # (CP, L)
    xin = x2m + x1m

    # Hoist the mask rows once (shared by both convs).
    mask_rows = [mask_ref[t:t + 1, :] if t != 4 else None for t in range(9)]

    def conv3x3(x, w, s):
        # x: (Cin, L);  w: (Crows, 9*Cin);  returns relu(w @ stack + s).
        pieces = []
        for t in range(9):
            dy, dx = t // 3 - 1, t % 3 - 1
            sft = dy * W + dx                    # flat-index offset of this tap
            if sft == 0:
                pieces.append(x)
            else:
                # xs[p] = x[p + sft]; wrap positions are exactly the masked
                # out-of-bounds / cross-image border pixels.
                xs = pltpu.roll(x, shift=(-sft) % L, axis=1)
                pieces.append(xs * mask_rows[t])
        stack = jnp.concatenate(pieces, axis=0)  # (9*Cin, L) sublane-aligned
        y = jnp.dot(w, stack, preferred_element_type=jnp.float32) + s
        return jnp.maximum(y, 0.0)

    y1 = conv3x3(xin, w1_ref[...], s1_ref[...])  # (CM, L); pad rows stay 0
    y2 = conv3x3(y1, w2_ref[...], s2_ref[...])   # (Cout, L)

    for n in range(G):                           # aligned 256-lane slices
        o_ref[n] = y2[:, n * HW:(n + 1) * HW].astype(o_ref.dtype)


# ----------------------------------------------------------------------------
# Parameters (deterministic, synthetic) and the Up forward pass.
# ----------------------------------------------------------------------------
def init_up_params(key, in_channels, out_channels):
    ks = jax.random.split(key, 12)

    def conv_block(kws, kbs, kg, kb, km, kv, cin, cout):
        w = 0.1 * jax.random.normal(kws, (3, 3, cin, cout), jnp.float32)  # HWIO
        b = 0.05 * jax.random.normal(kbs, (cout,), jnp.float32)
        gamma = 1.0 + 0.1 * jax.random.normal(kg, (cout,), jnp.float32)
        beta = 0.05 * jax.random.normal(kb, (cout,), jnp.float32)
        rmean = 0.1 * jax.random.normal(km, (cout,), jnp.float32)
        rvar = 1.0 + 0.2 * jax.random.uniform(kv, (cout,), jnp.float32)
        scale = gamma / jnp.sqrt(rvar + EPS)
        shift = beta - rmean * scale
        return dict(w=w, b=b, scale=scale, shift=shift)

    return dict(
        block1=conv_block(*ks[0:6], in_channels, out_channels),
        block2=conv_block(*ks[6:12], out_channels, out_channels),
    )


@partial(jax.jit, static_argnames=("num_groups",))
def up_forward(params, x1_nchw, x2_nchw, num_groups=1):
    # num_groups=1: whole batch merged into the lane axis, one grid step
    #               (best for single-TensorCore v5e / v6e).
    # num_groups=2: two parallel grid steps so both v7x TensorCores get work.
    N, C1, H1, W1 = x1_nchw.shape
    N2, C2, H2, W2 = x2_nchw.shape
    assert N == N2 and N % num_groups == 0
    G = N // num_groups
    HW, HW1 = H2 * W2, H1 * W1

    # Same constraint the PyTorch module implicitly has (torch.cat would fail
    # otherwise, given its quirky swapped pad amounts).
    assert H2 - 2 * H1 == W2 - 2 * W1 and H2 >= 2 * H1, "incompatible spatial sizes"

    # Trace-time constants.
    M = _upsample_pad_matrix_np(H1, W1, H2, W2)          # (HW1, HW)
    masks_g = np.tile(_boundary_masks_np(H2, W2), (1, G))  # (9, G*HW)

    # Fold BN + bias into lane-dense weights; pad channel counts to multiples
    # of 8 so every sublane block in the kernel stays tile-aligned.
    p1, p2 = params["block1"], params["block2"]
    Cout = p1["w"].shape[-1]
    CP = _round_up(C1 + C2, 8)      # conv1 input channels (concat), padded
    CM = _round_up(Cout, 8)         # conv1 output / conv2 input channels, padded
    w1k, s1k = _fold_conv(p1, cin_pad=CP, cout_pad=CM)    # (CM, 9*CP), (CM, 1)
    w2k, s2k = _fold_conv(p2, cin_pad=CM, cout_pad=Cout)  # (Cout, 9*CM), (Cout,1)

    # Flattened NCHW activations; place x2 in channel rows [0,C2) and x1 in
    # rows [C2,C2+C1) so the in-kernel channel concat is a plain add.
    x2p = jnp.pad(x2_nchw.reshape(N, C2, HW), ((0, 0), (0, CP - C2), (0, 0)))
    x1p = jnp.pad(x1_nchw.reshape(N, C1, HW1),
                  ((0, 0), (C2, CP - C2 - C1), (0, 0)))

    out = pl.pallas_call(
        partial(_up_doubleconv_kernel, G=G, H=H2, W=W2),
        out_shape=jax.ShapeDtypeStruct((N, Cout, HW), x2_nchw.dtype),
        grid=(num_groups,),
        in_specs=[
            pl.BlockSpec((G, CP, HW), lambda g: (g, 0, 0)),
            pl.BlockSpec((G, CP, HW1), lambda g: (g, 0, 0)),
            pl.BlockSpec((HW1, HW), lambda g: (0, 0)),
            pl.BlockSpec((9, G * HW), lambda g: (0, 0)),
            pl.BlockSpec((CM, 9 * CP), lambda g: (0, 0)),
            pl.BlockSpec((Cout, 9 * CM), lambda g: (0, 0)),
            pl.BlockSpec((CM, 1), lambda g: (0, 0)),
            pl.BlockSpec((Cout, 1), lambda g: (0, 0)),
        ],
        out_specs=pl.BlockSpec((G, Cout, HW), lambda g: (g, 0, 0)),
        compiler_params=pltpu.CompilerParams(
            dimension_semantics=("parallel",)),
    )(x2p, x1p, jnp.asarray(M), jnp.asarray(masks_g), w1k, w2k, s1k, s2k)

    # (N, Cout, H*W) is flattened NCHW -> free reshape, no transpose.
    return out.reshape(N, Cout, H2, W2)


# ----------------------------------------------------------------------------
# Plain-JAX reference (correctness check against the Pallas path).
# ----------------------------------------------------------------------------
def _ref_conv_bn_relu(x, w, b, scale, shift):
    y = lax.conv_general_dilated(
        x, w, window_strides=(1, 1), padding=((1, 1), (1, 1)),
        dimension_numbers=('NCHW', 'HWIO', 'NCHW'),
        precision=lax.Precision.HIGHEST)
    y = y + b[None, :, None, None]
    y = y * scale[None, :, None, None] + shift[None, :, None, None]
    return jnp.maximum(y, 0.0)


def ref_up_forward(params, x1_nchw, x2_nchw):
    N, C1, H1, W1 = x1_nchw.shape
    A = jnp.asarray(_interp_matrix_np(2 * H1, H1))
    B = jnp.asarray(_interp_matrix_np(2 * W1, W1))
    x1 = jnp.einsum('hH,ncHW,wW->nchw', A, x1_nchw, B,
                    precision=lax.Precision.HIGHEST)
    # Faithful to the module: x_diff (H sizes) pads W, y_diff (W sizes) pads H.
    x_diff = x2_nchw.shape[2] - x1.shape[2]
    y_diff = x2_nchw.shape[3] - x1.shape[3]
    x1 = jnp.pad(x1, ((0, 0), (0, 0),
                      (y_diff // 2, y_diff - y_diff // 2),
                      (x_diff // 2, x_diff - x_diff // 2)))
    x = jnp.concatenate([x2_nchw, x1], axis=1)
    p1, p2 = params["block1"], params["block2"]
    x = _ref_conv_bn_relu(x, p1["w"], p1["b"], p1["scale"], p1["shift"])
    x = _ref_conv_bn_relu(x, p2["w"], p2["b"], p2["scale"], p2["shift"])
    return x


if __name__ == "__main__":
    key = jax.random.PRNGKey(0)
    k_params, k_x1, k_x2 = jax.random.split(key, 3)

    in_channels, out_channels = 8, 4
    N = 2
    # x1: low-resolution feature map (in_channels // 2 channels, 8x8 spatial)
    # x2: skip connection            (in_channels // 2 channels, 16x16 spatial)
    x1 = jax.random.normal(k_x1, (N, in_channels // 2, 8, 8), jnp.float32)    # NCHW
    x2 = jax.random.normal(k_x2, (N, in_channels // 2, 16, 16), jnp.float32)  # NCHW

    params = init_up_params(k_params, in_channels, out_channels)

    out = up_forward(params, x1, x2)          # num_groups=1 (v5e/v6e default)
    out = jax.block_until_ready(out)
    assert out.shape == (N, out_channels, 16, 16), out.shape

    ref = jax.block_until_ready(ref_up_forward(params, x1, x2))
    np.testing.assert_allclose(np.asarray(out), np.asarray(ref),
                               rtol=1e-3, atol=1e-3)

    print("KERNEL_OK")
</pallas_src>

<mosaic_0001>
module attributes {stable_mosaic.version = 11 : i64} {
  func.func @_up_doubleconv_kernel(%arg0: i32, %arg1: memref<2x8x256xf32, #tpu.memory_space<vmem>>, %arg2: memref<2x8x64xf32, #tpu.memory_space<vmem>>, %arg3: memref<64x256xf32, #tpu.memory_space<vmem>>, %arg4: memref<9x512xf32, #tpu.memory_space<vmem>>, %arg5: memref<8x72xf32, #tpu.memory_space<vmem>>, %arg6: memref<4x72xf32, #tpu.memory_space<vmem>>, %arg7: memref<8x1xf32, #tpu.memory_space<vmem>>, %arg8: memref<4x1xf32, #tpu.memory_space<vmem>>, %arg9: memref<2x4x256xf32, #tpu.memory_space<vmem>>) attributes {dimension_semantics = [#tpu.dimension_semantics<parallel>], iteration_bounds = array<i64: 1>, scalar_prefetch = 0 : i64, scratch_operands = 0 : i64, tpu.core_type = #tpu.core_type<tc>, window_params = [{transform_indices = @transform_0, window_bounds = array<i64: 2, 8, 256>}, {transform_indices = @transform_1, window_bounds = array<i64: 2, 8, 64>}, {pipeline_mode = #tpu.pipeline_mode<synchronous>, transform_indices = @transform_2, window_bounds = array<i64: 64, 256>}, {pipeline_mode = #tpu.pipeline_mode<synchronous>, transform_indices = @transform_3, window_bounds = array<i64: 9, 512>}, {pipeline_mode = #tpu.pipeline_mode<synchronous>, transform_indices = @transform_4, window_bounds = array<i64: 8, 72>}, {pipeline_mode = #tpu.pipeline_mode<synchronous>, transform_indices = @transform_5, window_bounds = array<i64: 4, 72>}, {pipeline_mode = #tpu.pipeline_mode<synchronous>, transform_indices = @transform_6, window_bounds = array<i64: 8, 1>}, {pipeline_mode = #tpu.pipeline_mode<synchronous>, transform_indices = @transform_7, window_bounds = array<i64: 4, 1>}, {transform_indices = @transform_8, window_bounds = array<i64: 2, 4, 256>}]} {
    %c0 = arith.constant 0 : index
    %c0_0 = arith.constant 0 : index
    %0 = vector.load %arg3[%c0, %c0_0] : memref<64x256xf32, #tpu.memory_space<vmem>>, vector<64x256xf32>
    %c0_1 = arith.constant 0 : index
    %c0_2 = arith.constant 0 : index
    %c0_3 = arith.constant 0 : index
    %1 = vector.load %arg1[%c0_1, %c0_2, %c0_3] : memref<2x8x256xf32, #tpu.memory_space<vmem>>, vector<1x8x256xf32>
    %2 = vector.shape_cast %1 : vector<1x8x256xf32> to vector<8x256xf32>
    %c1 = arith.constant 1 : index
    %c0_4 = arith.constant 0 : index
    %c0_5 = arith.constant 0 : index
    %3 = vector.load %arg1[%c1, %c0_4, %c0_5] : memref<2x8x256xf32, #tpu.memory_space<vmem>>, vector<1x8x256xf32>
    %4 = vector.shape_cast %3 : vector<1x8x256xf32> to vector<8x256xf32>
    %5 = tpu.concatenate %2, %4 in 1 : vector<8x256xf32>, vector<8x256xf32> -> vector<8x512xf32>
    %c0_6 = arith.constant 0 : index
    %c0_7 = arith.constant 0 : index
    %c0_8 = arith.constant 0 : index
    %6 = vector.load %arg2[%c0_6, %c0_7, %c0_8] : memref<2x8x64xf32, #tpu.memory_space<vmem>>, vector<1x8x64xf32>
    %7 = vector.shape_cast %6 : vector<1x8x64xf32> to vector<8x64xf32>
    %cst = arith.constant dense<0.000000e+00> : vector<8x256xf32>
    %8 = tpu.matmul %7, %0, %cst {dimension_numbers = #tpu.dot_dimension_numbers<[1], [0], [0], [1], [0, 0, 1, 1], [], []>} : vector<8x64xf32>, vector<64x256xf32>, vector<8x256xf32> -> vector<8x256xf32>
    %c1_9 = arith.constant 1 : index
    %c0_10 = arith.constant 0 : index
    %c0_11 = arith.constant 0 : index
    %9 = vector.load %arg2[%c1_9, %c0_10, %c0_11] : memref<2x8x64xf32, #tpu.memory_space<vmem>>, vector<1x8x64xf32>
    %10 = vector.shape_cast %9 : vector<1x8x64xf32> to vector<8x64xf32>
    %cst_12 = arith.constant dense<0.000000e+00> : vector<8x256xf32>
    %11 = tpu.matmul %10, %0, %cst_12 {dimension_numbers = #tpu.dot_dimension_numbers<[1], [0], [0], [1], [0, 0, 1, 1], [], []>} : vector<8x64xf32>, vector<64x256xf32>, vector<8x256xf32> -> vector<8x256xf32>
    %12 = tpu.concatenate %8, %11 in 1 : vector<8x256xf32>, vector<8x256xf32> -> vector<8x512xf32>
    %13 = arith.addf %5, %12 : vector<8x512xf32>
    %c0_13 = arith.constant 0 : index
    %c0_14 = arith.constant 0 : index
    %14 = vector.load %arg4[%c0_13, %c0_14] : memref<9x512xf32, #tpu.memory_space<vmem>>, vector<1x512xf32>
    %c1_15 = arith.constant 1 : index
    %c0_16 = arith.constant 0 : index
    %15 = vector.load %arg4[%c1_15, %c0_16] : memref<9x512xf32, #tpu.memory_space<vmem>>, vector<1x512xf32>
    %c2 = arith.constant 2 : index
    %c0_17 = arith.constant 0 : index
    %16 = vector.load %arg4[%c2, %c0_17] : memref<9x512xf32, #tpu.memory_space<vmem>>, vector<1x512xf32>
    %c3 = arith.constant 3 : index
    %c0_18 = arith.constant 0 : index
    %17 = vector.load %arg4[%c3, %c0_18] : memref<9x512xf32, #tpu.memory_space<vmem>>, vector<1x512xf32>
    %c5 = arith.constant 5 : index
    %c0_19 = arith.constant 0 : index
    %18 = vector.load %arg4[%c5, %c0_19] : memref<9x512xf32, #tpu.memory_space<vmem>>, vector<1x512xf32>
    %c6 = arith.constant 6 : index
    %c0_20 = arith.constant 0 : index
    %19 = vector.load %arg4[%c6, %c0_20] : memref<9x512xf32, #tpu.memory_space<vmem>>, vector<1x512xf32>
    %c7 = arith.constant 7 : index
    %c0_21 = arith.constant 0 : index
    %20 = vector.load %arg4[%c7, %c0_21] : memref<9x512xf32, #tpu.memory_space<vmem>>, vector<1x512xf32>
    %c8 = arith.constant 8 : index
    %c0_22 = arith.constant 0 : index
    %21 = vector.load %arg4[%c8, %c0_22] : memref<9x512xf32, #tpu.memory_space<vmem>>, vector<1x512xf32>
    %c0_23 = arith.constant 0 : index
    %c0_24 = arith.constant 0 : index
    %22 = vector.load %arg5[%c0_23, %c0_24] : memref<8x72xf32, #tpu.memory_space<vmem>>, vector<8x72xf32>
    %c0_25 = arith.constant 0 : index
    %c0_26 = arith.constant 0 : index
    %23 = vector.load %arg7[%c0_25, %c0_26] : memref<8x1xf32, #tpu.memory_space<vmem>>, vector<8x1xf32>
    %c17_i32 = arith.constant 17 : i32
    %24 = tpu.dynamic_rotate %13 by %c17_i32 dim 1 : vector<8x512xf32>, i32 -> vector<8x512xf32>
    %25 = vector.broadcast %14 : vector<1x512xf32> to vector<8x512xf32>
    %26 = arith.mulf %24, %25 : vector<8x512xf32>
    %c16_i32 = arith.constant 16 : i32
    %27 = tpu.dynamic_rotate %13 by %c16_i32 dim 1 : vector<8x512xf32>, i32 -> vector<8x512xf32>
    %28 = vector.broadcast %15 : vector<1x512xf32> to vector<8x512xf32>
    %29 = arith.mulf %27, %28 : vector<8x512xf32>
    %c15_i32 = arith.constant 15 : i32
    %30 = tpu.dynamic_rotate %13 by %c15_i32 dim 1 : vector<8x512xf32>, i32 -> vector<8x512xf32>
    %31 = vector.broadcast %16 : vector<1x512xf32> to vector<8x512xf32>
    %32 = arith.mulf %30, %31 : vector<8x512xf32>
    %c1_i32 = arith.constant 1 : i32
    %33 = tpu.dynamic_rotate %13 by %c1_i32 dim 1 : vector<8x512xf32>, i32 -> vector<8x512xf32>
    %34 = vector.broadcast %17 : vector<1x512xf32> to vector<8x512xf32>
    %35 = arith.mulf %33, %34 : vector<8x512xf32>
    %c511_i32 = arith.constant 511 : i32
    %36 = tpu.dynamic_rotate %13 by %c511_i32 dim 1 : vector<8x512xf32>, i32 -> vector<8x512xf32>
    %37 = vector.broadcast %18 : vector<1x512xf32> to vector<8x512xf32>
    %38 = arith.mulf %36, %37 : vector<8x512xf32>
    %c497_i32 = arith.constant 497 : i32
    %39 = tpu.dynamic_rotate %13 by %c497_i32 dim 1 : vector<8x512xf32>, i32 -> vector<8x512xf32>
    %40 = vector.broadcast %19 : vector<1x512xf32> to vector<8x512xf32>
    %41 = arith.mulf %39, %40 : vector<8x512xf32>
    %c496_i32 = arith.constant 496 : i32
    %42 = tpu.dynamic_rotate %13 by %c496_i32 dim 1 : vector<8x512xf32>, i32 -> vector<8x512xf32>
    %43 = vector.broadcast %20 : vector<1x512xf32> to vector<8x512xf32>
    %44 = arith.mulf %42, %43 : vector<8x512xf32>
    %c495_i32 = arith.constant 495 : i32
    %45 = tpu.dynamic_rotate %13 by %c495_i32 dim 1 : vector<8x512xf32>, i32 -> vector<8x512xf32>
    %46 = vector.broadcast %21 : vector<1x512xf32> to vector<8x512xf32>
    %47 = arith.mulf %45, %46 : vector<8x512xf32>
    %48 = tpu.concatenate %26, %29, %32, %35, %13, %38, %41, %44, %47 in 0 : vector<8x512xf32>, vector<8x512xf32>, vector<8x512xf32>, vector<8x512xf32>, vector<8x512xf32>, vector<8x512xf32>, vector<8x512xf32>, vector<8x512xf32>, vector<8x512xf32> -> vector<72x512xf32>
    %cst_27 = arith.constant dense<0.000000e+00> : vector<8x512xf32>
    %49 = tpu.matmul %22, %48, %cst_27 {dimension_numbers = #tpu.dot_dimension_numbers<[1], [0], [0], [1], [0, 0, 1, 1], [], []>} : vector<8x72xf32>, vector<72x512xf32>, vector<8x512xf32> -> vector<8x512xf32>
    %50 = vector.broadcast %23 : vector<8x1xf32> to vector<8x512xf32>
    %51 = arith.addf %49, %50 : vector<8x512xf32>
    %cst_28 = arith.constant 0.000000e+00 : f32
    %52 = vector.broadcast %cst_28 : f32 to vector<8x512xf32>
    %53 = arith.maximumf %51, %52 : vector<8x512xf32>
    %c0_29 = arith.constant 0 : index
    %c0_30 = arith.constant 0 : index
    %54 = vector.load %arg6[%c0_29, %c0_30] : memref<4x72xf32, #tpu.memory_space<vmem>>, vector<4x72xf32>
    %c0_31 = arith.constant 0 : index
    %c0_32 = arith.constant 0 : index
    %55 = vector.load %arg8[%c0_31, %c0_32] : memref<4x1xf32, #tpu.memory_space<vmem>>, vector<4x1xf32>
    %c17_i32_33 = arith.constant 17 : i32
    %56 = tpu.dynamic_rotate %53 by %c17_i32_33 dim 1 : vector<8x512xf32>, i32 -> vector<8x512xf32>
    %57 = vector.broadcast %14 : vector<1x512xf32> to vector<8x512xf32>
    %58 = arith.mulf %56, %57 : vector<8x512xf32>
    %c16_i32_34 = arith.constant 16 : i32
    %59 = tpu.dynamic_rotate %53 by %c16_i32_34 dim 1 : vector<8x512xf32>, i32 -> vector<8x512xf32>
    %60 = vector.broadcast %15 : vector<1x512xf32> to vector<8x512xf32>
    %61 = arith.mulf %59, %60 : vector<8x512xf32>
    %c15_i32_35 = arith.constant 15 : i32
    %62 = tpu.dynamic_rotate %53 by %c15_i32_35 dim 1 : vector<8x512xf32>, i32 -> vector<8x512xf32>
    %63 = vector.broadcast %16 : vector<1x512xf32> to vector<8x512xf32>
    %64 = arith.mulf %62, %63 : vector<8x512xf32>
    %c1_i32_36 = arith.constant 1 : i32
    %65 = tpu.dynamic_rotate %53 by %c1_i32_36 dim 1 : vector<8x512xf32>, i32 -> vector<8x512xf32>
    %66 = vector.broadcast %17 : vector<1x512xf32> to vector<8x512xf32>
    %67 = arith.mulf %65, %66 : vector<8x512xf32>
    %c511_i32_37 = arith.constant 511 : i32
    %68 = tpu.dynamic_rotate %53 by %c511_i32_37 dim 1 : vector<8x512xf32>, i32 -> vector<8x512xf32>
    %69 = vector.broadcast %18 : vector<1x512xf32> to vector<8x512xf32>
    %70 = arith.mulf %68, %69 : vector<8x512xf32>
    %c497_i32_38 = arith.constant 497 : i32
    %71 = tpu.dynamic_rotate %53 by %c497_i32_38 dim 1 : vector<8x512xf32>, i32 -> vector<8x512xf32>
    %72 = vector.broadcast %19 : vector<1x512xf32> to vector<8x512xf32>
    %73 = arith.mulf %71, %72 : vector<8x512xf32>
    %c496_i32_39 = arith.constant 496 : i32
    %74 = tpu.dynamic_rotate %53 by %c496_i32_39 dim 1 : vector<8x512xf32>, i32 -> vector<8x512xf32>
    %75 = vector.broadcast %20 : vector<1x512xf32> to vector<8x512xf32>
    %76 = arith.mulf %74, %75 : vector<8x512xf32>
    %c495_i32_40 = arith.constant 495 : i32
    %77 = tpu.dynamic_rotate %53 by %c495_i32_40 dim 1 : vector<8x512xf32>, i32 -> vector<8x512xf32>
    %78 = vector.broadcast %21 : vector<1x512xf32> to vector<8x512xf32>
    %79 = arith.mulf %77, %78 : vector<8x512xf32>
    %80 = tpu.concatenate %58, %61, %64, %67, %53, %70, %73, %76, %79 in 0 : vector<8x512xf32>, vector<8x512xf32>, vector<8x512xf32>, vector<8x512xf32>, vector<8x512xf32>, vector<8x512xf32>, vector<8x512xf32>, vector<8x512xf32>, vector<8x512xf32> -> vector<72x512xf32>
    %cst_41 = arith.constant dense<0.000000e+00> : vector<4x512xf32>
    %81 = tpu.matmul %54, %80, %cst_41 {dimension_numbers = #tpu.dot_dimension_numbers<[1], [0], [0], [1], [0, 0, 1, 1], [], []>} : vector<4x72xf32>, vector<72x512xf32>, vector<4x512xf32> -> vector<4x512xf32>
    %82 = vector.broadcast %55 : vector<4x1xf32> to vector<4x512xf32>
    %83 = arith.addf %81, %82 : vector<4x512xf32>
    %cst_42 = arith.constant 0.000000e+00 : f32
    %84 = vector.broadcast %cst_42 : f32 to vector<4x512xf32>
    %85 = arith.maximumf %83, %84 : vector<4x512xf32>
    %86 = vector.extract_strided_slice %85 {offsets = [0, 0], sizes = [4, 256], strides = [1, 1]} : vector<4x512xf32> to vector<4x256xf32>
    %c0_43 = arith.constant 0 : index
    %c0_44 = arith.constant 0 : index
    %c0_45 = arith.constant 0 : index
    %87 = vector.load %arg9[%c0_43, %c0_44, %c0_45] : memref<2x4x256xf32, #tpu.memory_space<vmem>>, vector<1x4x256xf32>
    %88 = vector.shape_cast %87 : vector<1x4x256xf32> to vector<4x256xf32>
    %89 = vector.shape_cast %86 : vector<4x256xf32> to vector<1x4x256xf32>
    tpu.vector_store %arg9[%c0_43, %c0_44, %c0_45], %89 {strides = array<i32>} : memref<2x4x256xf32, #tpu.memory_space<vmem>>, vector<1x4x256xf32>,
    %90 = vector.extract_strided_slice %85 {offsets = [0, 256], sizes = [4, 256], strides = [1, 1]} : vector<4x512xf32> to vector<4x256xf32>
    %c1_46 = arith.constant 1 : index
    %c0_47 = arith.constant 0 : index
    %c0_48 = arith.constant 0 : index
    %91 = vector.load %arg9[%c1_46, %c0_47, %c0_48] : memref<2x4x256xf32, #tpu.memory_space<vmem>>, vector<1x4x256xf32>
    %92 = vector.shape_cast %91 : vector<1x4x256xf32> to vector<4x256xf32>
    %93 = vector.shape_cast %90 : vector<4x256xf32> to vector<1x4x256xf32>
    tpu.vector_store %arg9[%c1_46, %c0_47, %c0_48], %93 {strides = array<i32>} : memref<2x4x256xf32, #tpu.memory_space<vmem>>, vector<1x4x256xf32>,
    return
  }
  func.func @transform_0(%arg0: i32) -> (i32, i32, i32) {
    %c0_i32 = arith.constant 0 : i32
    %c0_i32_0 = arith.constant 0 : i32
    %c0_i32_1 = arith.constant 0 : i32
    return %arg0, %c0_i32, %c0_i32_0 : i32, i32, i32
  }
  func.func @transform_1(%arg0: i32) -> (i32, i32, i32) {
    %c0_i32 = arith.constant 0 : i32
    %c0_i32_0 = arith.constant 0 : i32
    %c0_i32_1 = arith.constant 0 : i32
    return %arg0, %c0_i32, %c0_i32_0 : i32, i32, i32
  }
  func.func @transform_2(%arg0: i32) -> (i32, i32) {
    %c0_i32 = arith.constant 0 : i32
    %c0_i32_0 = arith.constant 0 : i32
    %c0_i32_1 = arith.constant 0 : i32
    return %c0_i32, %c0_i32_0 : i32, i32
  }
  func.func @transform_3(%arg0: i32) -> (i32, i32) {
    %c0_i32 = arith.constant 0 : i32
    %c0_i32_0 = arith.constant 0 : i32
    %c0_i32_1 = arith.constant 0 : i32
    return %c0_i32, %c0_i32_0 : i32, i32
  }
  func.func @transform_4(%arg0: i32) -> (i32, i32) {
    %c0_i32 = arith.constant 0 : i32
    %c0_i32_0 = arith.constant 0 : i32
    %c0_i32_1 = arith.constant 0 : i32
    return %c0_i32, %c0_i32_0 : i32, i32
  }
  func.func @transform_5(%arg0: i32) -> (i32, i32) {
    %c0_i32 = arith.constant 0 : i32
    %c0_i32_0 = arith.constant 0 : i32
    %c0_i32_1 = arith.constant 0 : i32
    return %c0_i32, %c0_i32_0 : i32, i32
  }
  func.func @transform_6(%arg0: i32) -> (i32, i32) {
    %c0_i32 = arith.constant 0 : i32
    %c0_i32_0 = arith.constant 0 : i32
    %c0_i32_1 = arith.constant 0 : i32
    return %c0_i32, %c0_i32_0 : i32, i32
  }
  func.func @transform_7(%arg0: i32) -> (i32, i32) {
    %c0_i32 = arith.constant 0 : i32
    %c0_i32_0 = arith.constant 0 : i32
    %c0_i32_1 = arith.constant 0 : i32
    return %c0_i32, %c0_i32_0 : i32, i32
  }
  func.func @transform_8(%arg0: i32) -> (i32, i32, i32) {
    %c0_i32 = arith.constant 0 : i32
    %c0_i32_0 = arith.constant 0 : i32
    %c0_i32_1 = arith.constant 0 : i32
    return %arg0, %c0_i32, %c0_i32_0 : i32, i32, i32
  }
}

</mosaic_0001>

<bundles_post_ra>
// kernel: up_forward.1
= control target key start
LH: loop header
LB: loop body
LE: loop exit
PB: predicated region body
PF: predicated region fallthrough
CT: control target
= control target key end

     0   :  { %v1783_v3 = vmov 0.0   ;;  %vm51_vm0 = vcmask 523264   ;;  %s1109_s26 = smov 16   ;;  %s1110_s27 = smov 15   ;;  %v1115_v39 = vmov 0   ;;  %v231_v41 = vlaneseq  ;;  %s1774_s2 = inlined_call_operand.vmem [shape: f32[64,256], index: 2, kind: input, shape index: {}]   ;;  %s1775_s1 = inlined_call_operand.vmem [shape: f32[2,8,64], index: 1, kind: input, shape index: {}]   ;;  %s1776_s0 = inlined_call_operand.vmem [shape: f32[2,8,256], index: 0, kind: input, shape index: {}]   ;;  %s1777_s6 = inlined_call_operand.vmem [shape: f32[8,1], index: 6, kind: input, shape index: {}]   ;;  %s1778_s3 = inlined_call_operand.vmem [shape: f32[9,512], index: 3, kind: input, shape index: {}]   ;;  %s1779_s4 = inlined_call_operand.vmem [shape: f32[8,72], index: 4, kind: input, shape index: {}]   ;;  %s1780_s7 = inlined_call_operand.vmem [shape: f32[4,1], index: 7, kind: input, shape index: {}]   ;;  %s1781_s5 = inlined_call_operand.vmem [shape: f32[4,72], index: 5, kind: input, shape index: {}]   ;;  %s1782_s8 = inlined_call_operand.vmem [shape: f32[2,4,256], index: 8, kind: output, shape index: {}]  }
   0x1   :  { %v30_v0 = vld [vmem:[%s1774_s2 + $0x8] sm:$0xff]  ;;  %v32_v1 = vld [vmem:[%s1774_s2 + $0x18] sm:$0xff]  ;;  %v29_v2 = vld [vmem:[%s1774_s2] sm:$0xff]  ;;  %119 = vmatprep.mubr.f32.mxu0 %v1783_v3  ;;  %195 = vmatprep.mubr.f32.mxu1 %v1783_v3  ;;  %s1112_s28 = smov 127   ;;  %s1113_s29 = smov 113   ;;  %vm534_vm9 = vcmask 588800  }
   0x2   :  { %v1000_v4 = vpack.c.bf16 %v32_v1, %v30_v0  ;;  %v31_v5 = vld [vmem:[%s1774_s2 + $0x10] sm:$0xff]  ;;  %v34_v6 = vld [vmem:[%s1774_s2 + $0x28] sm:$0xff]  ;;  %v36_v7 = vld [vmem:[%s1774_s2 + $0x38] sm:$0xff]  ;;  %s1114_s30 = smov 112   ;;  %1106 = vset.pattern.permute.xlu0 %v1115_v39  ;;  %s1116_s9 = smov 111   ;;  %v240_v44 = vshrl.u32 %v231_v41, 7 }
   0x3   :  { %v1002_v8 = vpack.c.bf16 %v31_v5, %v29_v2  ;;  %v1004_v9 = vpack.c.bf16 %v36_v7, %v34_v6  ;;  %v33_v10 = vld [vmem:[%s1774_s2 + $0x20] sm:$0xff]  ;;  %v35_v11 = vld [vmem:[%s1774_s2 + $0x30] sm:$0xff]  ;;  %v38_v12 = vld [vmem:[%s1774_s2 + $0x48] sm:$0xff]  ;;  %v1311_v45 = vand.u32 127, %v231_v41 }
   0x4   :  { %1001 = vmatprep.subr.bf16.mxu0 %v1000_v4  ;;  %1017 = vmatprep.subr.bf16.mxu1 %v1000_v4  ;;  %v40_v13 = vld [vmem:[%s1774_s2 + $0x58] sm:$0xff]  ;;  %v1006_v14 = vpack.c.bf16 %v35_v11, %v33_v10  ;;  %v37_v16 = vld [vmem:[%s1774_s2 + $0x40] sm:$0xff]  ;;  %v39_v17 = vld [vmem:[%s1774_s2 + $0x50] sm:$0xff]  ;;  %v1313_v48 = vsub.s32 3, %v240_v44  ;;  %v1343_v5 = vsub.s32 0, %v240_v44  ;;  %v1345_v6 = vsub.s32 1, %v240_v44 }
   0x5   :  { %1003 = vmatpush1.bf16.msra.mxu0 %v1002_v8  ;;  %1019 = vmatpush1.bf16.msra.mxu1 %v1002_v8  ;;  %v1008_v15 = vpack.c.bf16 %v40_v13, %v38_v12  ;;  %v42_v18 = vld [vmem:[%s1774_s2 + $0x68] sm:$0xff]  ;;  %v44_v19 = vld [vmem:[%s1774_s2 + $0x78] sm:$0xff]  ;;  %v1010_v20 = vpack.c.bf16 %v39_v17, %v37_v16  ;;  %v41_v22 = vld [vmem:[%s1774_s2 + $0x60] sm:$0xff]  ;;  %vm233_vm1 = vcmp.lt.s32.totalorder %v1311_v45, 17  ;;  %vm271_vm2 = vcmp.lt.s32.totalorder %v1311_v45, 16 }
   0x6   :  { %1005 = vmatprep.subr.bf16.mxu0 %v1004_v9  ;;  %1021 = vmatprep.subr.bf16.mxu1 %v1004_v9  ;;  %v1012_v21 = vpack.c.bf16 %v44_v19, %v42_v18  ;;  %v43_v23 = vld [vmem:[%s1774_s2 + $0x70] sm:$0xff]  ;;  %v50_v25 = vld [vmem:[%s1775_s1] sm:$0xff]  ;;  %v986_v26 = vld [vmem:[%s1775_s1 + $0x8] sm:$0xff]  ;;  %s1108_s1 = smov 17   ;;  %v1347_v7 = vsub.s32 2, %v240_v44  ;;  %vm309_vm3 = vcmp.lt.s32.totalorder %v1311_v45, 15 }
   0x7   :  { %v1014_v24 = vpack.c.bf16 %v43_v23, %v41_v22  ;;  %v45_v27 = vld [vmem:[%s1776_s0] sm:$0xff]  ;;  %v983_v28 = vld [vmem:[%s1776_s0 + $0x10] sm:$0xff]  ;;  %v984_v31 = vld [vmem:[%s1776_s0 + $0x18] sm:$0xff]  ;;  %vm347_vm4 = vcmp.lt.s32.totalorder %v1311_v45, 1  ;;  %vm385_vm5 = vcmp.lt.s32.totalorder %v1311_v45, 127  ;;  %vm423_vm6 = vcmp.lt.s32.totalorder %v1311_v45, 113 }
   0x8   :  { %v46_v37 = vld [vmem:[%s1776_s0 + $0x8] sm:$0xff]  ;;  %s1111_s0 = smov 1   ;;  %v222_v40 = vld [vmem:[%s1777_s6] sm:$0xff]  ;;  %vm461_vm7 = vcmp.lt.s32.totalorder %v1311_v45, 112  ;;  %vm499_vm8 = vcmp.lt.s32.totalorder %v1311_v45, 111 }
   0x9   :  { %1007 = vmatpush1.bf16.msra.mxu0 %v1006_v14  ;;  %1023 = vmatpush1.bf16.msra.mxu1 %v1006_v14  ;;  %v1318_v49 = vld [vmem:[%s1778_s3] ss:$8 sm:$0xf]  ;;  %v988_v52 = vld [vmem:[%s1778_s3 + $0x1] ss:$8 sm:$0xf] }
   0xa   :  { %1009 = vmatprep.subr.bf16.mxu0 %v1008_v15  ;;  %1025 = vmatprep.subr.bf16.mxu1 %v1008_v15  ;;  %v1326_v53 = vrot.slane %v1318_v49, %v1313_v48  ;;  %v1329_v54 = vrot.slane %v988_v52, %v1313_v48  ;;  %v989_v10 = vld [vmem:[%s1778_s3 + $0x2] ss:$8 sm:$0xf]  ;;  %v1356_v11 = vrot.slane %v1318_v49, %v1343_v5  ;;  %v990_v13 = vld [vmem:[%s1778_s3 + $0x3] ss:$8 sm:$0xf] }
   0xb   :  { %v1359_v12 = vrot.slane %v988_v52, %v1343_v5  ;;  %v1365_v14 = vrot.slane %v988_v52, %v1345_v6  ;;  %v1368_v15 = vrot.slane %v988_v52, %v1347_v7  ;;  %v1374_v19 = vrot.slane %v989_v10, %v1345_v6  ;;  %v991_v23 = vld [vmem:[%s1778_s3 + $0x5] ss:$8 sm:$0xf] }
   0xc   :  { %v1383_v22 = vrot.slane %v989_v10, %v1313_v48  ;;  %v1420_v41 = vrot.slane %v991_v23, %v1347_v7  ;;  %v1423_v44 = vrot.slane %v991_v23, %v1313_v48  ;;  %v1440_v52 = vrot.slane %v1318_v49, %v1347_v7 }
   0xd   :  { %1011 = vmatpush1.bf16.msra.mxu0 %v1010_v20  ;;  %1027 = vmatpush1.bf16.msra.mxu1 %v1010_v20  ;;  %v1377_v20 = vrot.slane %v989_v10, %v1347_v7 }
   0xe   :  { %1013 = vmatprep.subr.bf16.mxu0 %v1012_v21  ;;  %1029 = vmatprep.subr.bf16.mxu1 %v1012_v21  ;;  %v1380_v21 = vrot.slane %v989_v10, %v1343_v5 }
  0x11   :  { %1015 = vmatpush1.bf16.msra.mxu0 %v1014_v24  ;;  %1031 = vmatpush1.bf16.msra.mxu1 %v1014_v24 }
  0x14   :  { %985 = vmatmul.mubr.msk.f32.vlgmr.msra.gmra.mrb[0].mxu0 %vm51_vm0, %v50_v25  ;;  %987 = vmatmul.mubr.msk.f32.vlgmr.msra.gmra.mrb[0].mxu1 %vm51_vm0, %v986_v26  ;;  %v1393_v25 = vrot.slane %v990_v13, %v1345_v6  ;;  %v1396_v26 = vrot.slane %v990_v13, %v1347_v7 }
  0x15   :  { %602 = vmatprep.mubr.f32.mxu0 %v1783_v3  ;;  %673 = vmatprep.mubr.f32.mxu1 %v1783_v3 }
  0xe7   :  { %v121_v29 = vpop.f32.mrb[0].mxu0  ;;  %v197_v30 = vpop.f32.mrb[0].mxu1 }
  0xe8   :  { %v1229_v32 = vadd.f32 %v121_v29, %v45_v27  ;;  %v1231_v33 = vadd.f32 %v983_v28, %v197_v30  ;;  %v123_v34 = vpop.f32.mrb[1].mxu0  ;;  %v199_v35 = vpop.f32.mrb[1].mxu1  ;;  %v1400_v28 = vrot.slane %v990_v13, %v1343_v5  ;;  %v1403_v29 = vrot.slane %v990_v13, %v1313_v48 }
  0xe9   :  { %v1237_v36 = vadd.f32 %v984_v31, %v199_v35  ;;  %v1246_v38 = vadd.f32 %v123_v34, %v46_v37  ;;  %v1411_v34 = vrot.slane %v991_v23, %v1343_v5  ;;  %v1414_v35 = vrot.slane %v991_v23, %v1345_v6 }
  0xea   :  { %227 = vrot.lane.b32.xlu1 %v1231_v33, %s1108_s1  ;;  %223 = vrot.lane.b32.xlu0 %v1229_v32, %s1108_s1 }
  0xee   :  { %229 = vrot.lane.b32.xlu1 %v1237_v36, %s1108_s1  ;;  %263 = vrot.lane.b32.xlu0 %v1229_v32, %s1109_s26 }
  0xf2   :  { %265 = vrot.lane.b32.xlu1 %v1246_v38, %s1109_s26  ;;  %267 = vrot.lane.b32.xlu0 %v1231_v33, %s1109_s26 }
  0xf6   :  { %269 = vrot.lane.b32.xlu1 %v1237_v36, %s1109_s26  ;;  %301 = vrot.lane.b32.xlu0 %v1229_v32, %s1110_s27 }
  0xfa   :  { %303 = vrot.lane.b32.xlu1 %v1246_v38, %s1110_s27  ;;  %305 = vrot.lane.b32.xlu0 %v1231_v33, %s1110_s27 }
  0xfe   :  { %307 = vrot.lane.b32.xlu1 %v1237_v36, %s1110_s27  ;;  %339 = vrot.lane.b32.xlu0 %v1229_v32, %s1111_s0 }
 0x102   :  { %341 = vrot.lane.b32.xlu1 %v1246_v38, %s1111_s0  ;;  %343 = vrot.lane.b32.xlu0 %v1231_v33, %s1111_s0 }
 0x106   :  { %345 = vrot.lane.b32.xlu1 %v1237_v36, %s1111_s0  ;;  %377 = vrot.lane.b32.xlu0 %v1229_v32, %s1112_s28 }
 0x10a   :  { %379 = vrot.lane.b32.xlu1 %v1246_v38, %s1112_s28  ;;  %381 = vrot.lane.b32.xlu0 %v1231_v33, %s1112_s28 }
 0x10e   :  { %383 = vrot.lane.b32.xlu1 %v1237_v36, %s1112_s28  ;;  %415 = vrot.lane.b32.xlu0 %v1229_v32, %s1113_s29 }
 0x112   :  { %417 = vrot.lane.b32.xlu1 %v1246_v38, %s1113_s29  ;;  %225 = vrot.lane.b32.xlu0 %v1246_v38, %s1108_s1 }
 0x116   :  { %421 = vrot.lane.b32.xlu1 %v1237_v36, %s1113_s29  ;;  %419 = vrot.lane.b32.xlu0 %v1231_v33, %s1113_s29 }
 0x11a   :  { %455 = vrot.lane.b32.xlu1 %v1246_v38, %s1114_s30  ;;  %453 = vrot.lane.b32.xlu0 %v1229_v32, %s1114_s30 }
 0x11e   :  { %459 = vrot.lane.b32.xlu1 %v1237_v36, %s1114_s30  ;;  %457 = vrot.lane.b32.xlu0 %v1231_v33, %s1114_s30 }
 0x122   :  { %493 = vrot.lane.b32.xlu1 %v1246_v38, %s1116_s9  ;;  %491 = vrot.lane.b32.xlu0 %v1229_v32, %s1116_s9 }
 0x126   :  { %497 = vrot.lane.b32.xlu1 %v1237_v36, %s1116_s9  ;;  %495 = vrot.lane.b32.xlu0 %v1231_v33, %s1116_s9 }
 0x12a   :  { %531 = vperm.xlu0 %1106, %v222_v40  }
 0x15c   :  { %v1307_v42 = vpop.permute.xlu1 %227  ;;  %v1309_v43 = vpop.permute.xlu0 %223 }
 0x160   :  { %v230_v46 = vpop.permute.xlu1 %229  ;;  %v264_v47 = vpop.permute.xlu0 %263 }
 0x161   :  { %v234_v55 = vsel %vm233_vm1, %v1307_v42, %v230_v46  ;;  %v237_v24 = vsel %vm233_vm1, %v230_v46, %v1309_v43  ;;  %v1428_v46 = vld [vmem:[%s1778_s3 + $0x6] ss:$8 sm:$0xf] }
 0x162   :  { %v262_v59 = vmul.f32 %v1326_v53, %v234_v55  ;;  %v259_v40 = vmul.f32 %v1356_v11, %v237_v24  ;;  %v1444_v55 = vrot.slane %v1428_v46, %v1313_v48 }
 0x164   :  { %v266_v50 = vpop.permute.xlu1 %265  ;;  %v268_v51 = vpop.permute.xlu0 %267 }
 0x165   :  { %v274_v30 = vsel %vm271_vm2, %v264_v47, %v266_v50  ;;  %v273_v31 = vsel %vm271_vm2, %v266_v50, %v268_v51 }
 0x168   :  { %v270_v56 = vpop.permute.xlu1 %269  ;;  %v1335_v57 = vpop.permute.xlu0 %301 }
 0x169   :  { %v272_v58 = vsel %vm271_vm2, %v268_v51, %v270_v56  ;;  %v275_v16 = vsel %vm271_vm2, %v270_v56, %v264_v47  ;;  %v1432_v47 = vrot.slane %v1318_v49, %v1345_v6  ;;  %v298_v56 = vmul.f32 %v1365_v14, %v274_v30 }
 0x16a   :  { %v300_v60 = vmul.f32 %v1329_v54, %v272_v58  ;;  %v297_v27 = vmul.f32 %v1359_v12, %v275_v16  ;;  %v299_v58 = vmul.f32 %v1368_v15, %v273_v31 }
 0x16c   :  { %v304_v61 = vpop.permute.xlu1 %303  ;;  %v306_v62 = vpop.permute.xlu0 %305  ;;  %v1048_v63 = vpack.c.bf16 %v300_v60, %v262_v59  ;;  %v1034_v59 = vpack.c.bf16 %v297_v27, %v259_v40  ;;  %v1450_v60 = vrot.slane %v1428_v46, %v1345_v6 }
 0x16d   :  { %v311_v49 = vsel %vm309_vm3, %v304_v61, %v306_v62 }
 0x16e   :  { %1049 = vmatprep.subr.bf16.mxu1 %v1048_v63  ;;  %v312_v63 = vsel %vm309_vm3, %v1335_v57, %v304_v61  ;;  %v337_v3 = vmul.f32 %v1377_v20, %v311_v49 }
 0x16f   :  { %v336_v40 = vmul.f32 %v1374_v19, %v312_v63 }
 0x170   :  { %v1341_v0 = vpop.permute.xlu1 %307  ;;  %v340_v1 = vpop.permute.xlu0 %339 }
 0x171   :  { %v310_v10 = vsel %vm309_vm3, %v306_v62, %v1341_v0 }
 0x174   :  { %v342_v2 = vpop.permute.xlu1 %341  ;;  %v344_v4 = vpop.permute.xlu0 %343 }
 0x175   :  { %v350_v50 = vsel %vm347_vm4, %v340_v1, %v342_v2  ;;  %v349_v13 = vsel %vm347_vm4, %v342_v2, %v344_v4 }
 0x176   :  { %v374_v24 = vmul.f32 %v1393_v25, %v350_v50 }
 0x178   :  { %v346_v8 = vpop.permute.xlu1 %345  ;;  %v1349_v9 = vpop.permute.xlu0 %377 }
 0x179   :  { %v348_v51 = vsel %vm347_vm4, %v344_v4, %v346_v8  ;;  %v351_v62 = vsel %vm347_vm4, %v346_v8, %v340_v1  ;;  %v375_v8 = vmul.f32 %v1396_v26, %v349_v13  ;;  %v993_v13 = vld [vmem:[%s1778_s3 + $0x7] ss:$8 sm:$0xf] }
 0x17a   :  { %v376_v27 = vmul.f32 %v1403_v29, %v348_v51 }
 0x17c   :  { %v380_v17 = vpop.permute.xlu1 %379  ;;  %v382_v18 = vpop.permute.xlu0 %381 }
 0x17d   :  { %v387_v1 = vsel %vm385_vm5, %v380_v17, %v382_v18  ;;  %v388_v50 = vsel %vm385_vm5, %v1349_v9, %v380_v17  ;;  %v1036_v17 = vpack.c.bf16 %v374_v24, %v336_v40 }
 0x180   :  { %v384_v37 = vpop.permute.xlu1 %383  ;;  %v1416_v39 = vpop.permute.xlu0 %415 }
 0x181   :  { %v389_v2 = vsel %vm385_vm5, %v384_v37, %v1349_v9  ;;  %v412_v9 = vmul.f32 %v1414_v35, %v387_v1  ;;  %v1526_v1 = vrot.slane %v993_v13, %v1347_v7 }
 0x184   :  { %v418_v16 = vpop.permute.xlu1 %417  ;;  %v226_v23 = vpop.permute.xlu0 %225 }
 0x185   :  { %v235_v30 = vsel %vm233_vm1, %v226_v23, %v1307_v42  ;;  %v236_v61 = vsel %vm233_vm1, %v1309_v43, %v226_v23  ;;  %v313_v42 = vsel %vm309_vm3, %v1341_v0, %v1335_v57  ;;  %v338_v43 = vmul.f32 %v1383_v22, %v310_v10 }
 0x186   :  { %v260_v4 = vmul.f32 %v1432_v47, %v236_v61  ;;  %v261_v31 = vmul.f32 %v1440_v52, %v235_v30  ;;  %v373_v61 = vmul.f32 %v1400_v28, %v351_v62  ;;  %v386_v57 = vsel %vm385_vm5, %v382_v18, %v384_v37 }
 0x187   :  { %v414_v0 = vmul.f32 %v1423_v44, %v389_v2  ;;  %v1052_v10 = vpack.c.bf16 %v376_v27, %v338_v43  ;;  %v411_v18 = vmul.f32 %v1411_v34, %v388_v50  ;;  %v1503_v37 = vrot.slane %v1428_v46, %v1347_v7 }
 0x188   :  { %v1050_v51 = vpack.c.bf16 %v299_v58, %v261_v31  ;;  %v422_v23 = vpop.permute.xlu1 %421  ;;  %v420_v30 = vpop.permute.xlu0 %419  ;;  %v1032_v63 = vpack.c.bf16 %v298_v56, %v260_v4  ;;  %v335_v56 = vmul.f32 %v1380_v21, %v313_v42  ;;  %v1054_v58 = vpack.c.bf16 %v375_v8, %v337_v3 }
 0x189   :  { %v413_v49 = vmul.f32 %v1420_v41, %v386_v57  ;;  %v1508_v62 = vrot.slane %v993_v13, %v1343_v5  ;;  %v1511_v2 = vrot.slane %v993_v13, %v1313_v48  ;;  %v425_v31 = vsel %vm423_vm6, %v418_v16, %v420_v30 }
 0x18a   :  { %1033 = vmatprep.subr.bf16.mxu0 %v1032_v63  ;;  %1051 = vmatpush1.bf16.msra.mxu1 %v1050_v51  ;;  %v1038_v4 = vpack.c.bf16 %v373_v61, %v335_v56  ;;  %v1056_v3 = vpack.c.bf16 %v414_v0, %v1237_v36  ;;  %v1040_v42 = vpack.c.bf16 %v412_v9, %v1246_v38  ;;  %v994_v56 = vld [vmem:[%s1778_s3 + $0x20] ss:$8 sm:$0xf] }
 0x18b   :  { %1035 = vmatpush1.bf16.msra.mxu0 %v1034_v59  ;;  %1053 = vmatprep.subr.bf16.mxu1 %v1052_v10  ;;  %v427_v59 = vsel %vm423_vm6, %v422_v23, %v1416_v39  ;;  %v1523_v43 = vrot.slane %v993_v13, %v1345_v6  ;;  %v1042_v8 = vpack.c.bf16 %v411_v18, %v1229_v32 }
 0x18c   :  { %v456_v27 = vpop.permute.xlu1 %455  ;;  %1037 = vmatprep.subr.bf16.mxu0 %v1036_v17  ;;  %v454_v24 = vpop.permute.xlu0 %453  ;;  %v1531_v50 = vrot.slane %v1428_v46, %v1343_v5  ;;  %v424_v36 = vsel %vm423_vm6, %v420_v30, %v422_v23  ;;  %v1058_v51 = vpack.c.bf16 %v413_v49, %v1231_v33  ;;  %v426_v38 = vsel %vm423_vm6, %v1416_v39, %v418_v16 }
 0x18d   :  { %v464_v40 = vsel %vm461_vm7, %v454_v24, %v456_v27  ;;  %v452_v63 = vmul.f32 %v1444_v55, %v427_v59  ;;  %v450_v61 = vmul.f32 %v1450_v60, %v425_v31  ;;  %v451_v39 = vmul.f32 %v1503_v37, %v424_v36 }
 0x18e   :  { %1055 = vmatpush1.bf16.msra.mxu1 %v1054_v58  ;;  %v487_v46 = vmul.f32 %v1508_v62, %v464_v40  ;;  %v449_v13 = vmul.f32 %v1531_v50, %v426_v38  ;;  %v1564_v59 = vrot.slane %v994_v56, %v1347_v7  ;;  %v1567_v31 = vrot.slane %v994_v56, %v1343_v5  ;;  %v221_v38 = vld [vmem:[%s1779_s4] sm:$0xff] }
 0x18f   :  { %1039 = vmatpush1.bf16.msra.mxu0 %v1038_v4  ;;  %1057 = vmatprep.subr.bf16.mxu1 %v1056_v3  ;;  %v1561_v4 = vrot.slane %v994_v56, %v1345_v6 }
 0x190   :  { %v460_v32 = vpop.permute.xlu1 %459  ;;  %1041 = vmatprep.subr.bf16.mxu0 %v1040_v42  ;;  %v458_v57 = vpop.permute.xlu0 %457 }
 0x191   :  { %v465_v23 = vsel %vm461_vm7, %v460_v32, %v454_v24  ;;  %v462_v30 = vsel %vm461_vm7, %v458_v57, %v460_v32  ;;  %v463_v33 = vsel %vm461_vm7, %v456_v27, %v458_v57  ;;  %v1046_v27 = vpack.c.bf16 %v487_v46, %v449_v13 }
 0x192   :  { %v490_v16 = vmul.f32 %v1511_v2, %v465_v23  ;;  %v488_v0 = vmul.f32 %v1523_v43, %v463_v33  ;;  %v489_v10 = vmul.f32 %v1526_v1, %v462_v30  ;;  %1059 = vmatpush1.bf16.msra.mxu1 %v1058_v51  ;;  %v1558_v24 = vrot.slane %v994_v56, %v1313_v48 }
 0x193   :  { %1043 = vmatpush1.bf16.msra.mxu0 %v1042_v8 }
 0x194   :  { %v1062_v9 = vpack.c.bf16 %v489_v10, %v451_v39  ;;  %v494_v17 = vpop.permute.xlu1 %493  ;;  %v492_v18 = vpop.permute.xlu0 %491  ;;  %v1044_v58 = vpack.c.bf16 %v488_v0, %v450_v61  ;;  %v1060_v49 = vpack.c.bf16 %v490_v16, %v452_v63  ;;  %v1785_v63 = vmov 0.0  }
 0x195   :  { %v502_v3 = vsel %vm499_vm8, %v492_v18, %v494_v17 }
 0x196   :  { %1045 = vmatprep.subr.bf16.mxu0 %v1044_v58  ;;  %1061 = vmatprep.subr.bf16.mxu1 %v1060_v49  ;;  %v525_v51 = vmul.f32 %v1567_v31, %v502_v3 }
 0x197   :  { %1047 = vmatpush1.bf16.msra.mxu0 %v1046_v27  ;;  %1063 = vmatpush1.bf16.msra.mxu1 %v1062_v9 }
 0x198   :  { %v498_v40 = vpop.permute.xlu1 %497  ;;  %v496_v42 = vpop.permute.xlu0 %495 }
 0x199   :  { %v503_v48 = vsel %vm499_vm8, %v498_v40, %v492_v18  ;;  %v500_v6 = vsel %vm499_vm8, %v496_v42, %v498_v40  ;;  %v501_v7 = vsel %vm499_vm8, %v494_v17, %v496_v42  ;;  %v685_v17 = vld [vmem:[%s1780_s7] sm:$0xf] }
 0x19a   :  { %v528_v8 = vmul.f32 %v1558_v24, %v503_v48  ;;  %v526_v5 = vmul.f32 %v1561_v4, %v501_v7  ;;  %v527_v36 = vmul.f32 %v1564_v59, %v500_v6 }
 0x19c   :  { %554 = vmatprep.subr.mxu0 %v526_v5  ;;  %625 = vmatprep.subr.mxu1 %v528_v8 }
 0x19d   :  { %555 = vmatpush1.msra.mxu0 %v525_v51  ;;  %626 = vmatpush1.msra.mxu1 %v527_v36 }
 0x19e   :  { %995 = vmatmul.mubr.msk.f32.vlgmr.msra.gmra.mrb[2].mxu0 %vm534_vm9, %v221_v38  ;;  %996 = vmatmul.mubr.msk.f32.vlgmr.msra.gmra.mrb[2].mxu1 %vm534_vm9, %v221_v38 }
 0x19f   :  { %886 = vmatprep.mubr.f32.mxu0 %v1785_v63  ;;  %957 = vmatprep.mubr.f32.mxu1 %v1785_v63 }
 0x1a9   :  { %v532_v61 = vpop.permute.xlu0 %531 }
 0x271   :  { %v604_v32 = vpop.f32.mrb[2].mxu0  ;;  %v675_v57 = vpop.f32.mrb[2].mxu1 }
 0x272   :  { %v605_v46 = vadd.f32 %v604_v32, %v532_v61  ;;  %v676_v23 = vadd.f32 %v675_v57, %v532_v61  ;;  %v606_v30 = vpop.f32.mrb[3].mxu0  ;;  %v677_v33 = vpop.f32.mrb[3].mxu1 }
 0x273   :  { %v607_v0 = vadd.f32 %v606_v30, %v532_v61  ;;  %v678_v13 = vadd.f32 %v677_v33, %v532_v61 }
 0x274   :  { %v1588_v39 = vmax.f32 %v605_v46, 0.0  ;;  %v1590_v16 = vmax.f32 %v676_v23, 0.0 }
 0x275   :  { %v1596_v10 = vmax.f32 %v607_v0, 0.0  ;;  %v1602_v9 = vmax.f32 %v678_v13, 0.0 }
 0x276   :  { %690 = vrot.lane.b32.xlu0 %v1590_v16, %s1108_s1  ;;  %686 = vrot.lane.b32.xlu1 %v1588_v39, %s1108_s1 }
 0x27a   :  { %702 = vrot.lane.b32.xlu0 %v1588_v39, %s1109_s26  ;;  %688 = vrot.lane.b32.xlu1 %v1596_v10, %s1108_s1 }
 0x27e   :  { %706 = vrot.lane.b32.xlu0 %v1590_v16, %s1109_s26  ;;  %692 = vrot.lane.b32.xlu1 %v1602_v9, %s1108_s1 }
 0x282   :  { %718 = vrot.lane.b32.xlu0 %v1588_v39, %s1110_s27  ;;  %704 = vrot.lane.b32.xlu1 %v1596_v10, %s1109_s26 }
 0x286   :  { %722 = vrot.lane.b32.xlu0 %v1590_v16, %s1110_s27  ;;  %708 = vrot.lane.b32.xlu1 %v1602_v9, %s1109_s26 }
 0x28a   :  { %734 = vrot.lane.b32.xlu0 %v1588_v39, %s1111_s0  ;;  %720 = vrot.lane.b32.xlu1 %v1596_v10, %s1110_s27 }
 0x28e   :  { %738 = vrot.lane.b32.xlu0 %v1590_v16, %s1111_s0  ;;  %724 = vrot.lane.b32.xlu1 %v1602_v9, %s1110_s27 }
 0x292   :  { %750 = vrot.lane.b32.xlu0 %v1588_v39, %s1112_s28  ;;  %736 = vrot.lane.b32.xlu1 %v1596_v10, %s1111_s0 }
 0x296   :  { %754 = vrot.lane.b32.xlu0 %v1590_v16, %s1112_s28  ;;  %740 = vrot.lane.b32.xlu1 %v1602_v9, %s1111_s0 }
 0x29a   :  { %766 = vrot.lane.b32.xlu0 %v1588_v39, %s1113_s29  ;;  %752 = vrot.lane.b32.xlu1 %v1596_v10, %s1112_s28 }
 0x29e   :  { %770 = vrot.lane.b32.xlu0 %v1590_v16, %s1113_s29  ;;  %756 = vrot.lane.b32.xlu1 %v1602_v9, %s1112_s28 }
 0x2a2   :  { %782 = vrot.lane.b32.xlu0 %v1588_v39, %s1114_s30  ;;  %768 = vrot.lane.b32.xlu1 %v1596_v10, %s1113_s29 }
 0x2a6   :  { %786 = vrot.lane.b32.xlu0 %v1590_v16, %s1114_s30  ;;  %772 = vrot.lane.b32.xlu1 %v1602_v9, %s1113_s29 }
 0x2aa   :  { %798 = vrot.lane.b32.xlu0 %v1588_v39, %s1116_s9  ;;  %784 = vrot.lane.b32.xlu1 %v1596_v10, %s1114_s30 }
 0x2ae   :  { %802 = vrot.lane.b32.xlu0 %v1590_v16, %s1116_s9  ;;  %788 = vrot.lane.b32.xlu1 %v1602_v9, %s1114_s30 }
 0x2b2   :  { %816 = vperm.xlu0 %1106, %v685_v17   ;;  %800 = vrot.lane.b32.xlu1 %v1596_v10, %s1116_s9 }
 0x2b6   :  { %804 = vrot.lane.b32.xlu1 %v1602_v9, %s1116_s9 }
 0x2e8   :  { %v691_v56 = vpop.permute.xlu0 %690  ;;  %v687_v18 = vpop.permute.xlu1 %686 }
 0x2ec   :  { %v703_v58 = vpop.permute.xlu0 %702  ;;  %v689_v49 = vpop.permute.xlu1 %688 }
 0x2ed   :  { %v696_v40 = vsel %vm233_vm1, %v687_v18, %v689_v49  ;;  %v695_v38 = vsel %vm233_vm1, %v689_v49, %v691_v56 }
 0x2ee   :  { %v699_v7 = vmul.f32 %v696_v40, %v1432_v47  ;;  %v700_v0 = vmul.f32 %v695_v38, %v1440_v52 }
 0x2f0   :  { %v707_v27 = vpop.permute.xlu0 %706  ;;  %v693_v3 = vpop.permute.xlu1 %692 }
 0x2f1   :  { %v694_v36 = vsel %vm233_vm1, %v691_v56, %v693_v3  ;;  %v697_v51 = vsel %vm233_vm1, %v693_v3, %v687_v18 }
 0x2f2   :  { %v698_v46 = vmul.f32 %v697_v51, %v1356_v11  ;;  %v701_v23 = vmul.f32 %v694_v36, %v1326_v53 }
 0x2f4   :  { %v719_v42 = vpop.permute.xlu0 %718  ;;  %v705_v48 = vpop.permute.xlu1 %704 }
 0x2f5   :  { %v712_v6 = vsel %vm271_vm2, %v703_v58, %v705_v48  ;;  %v711_v8 = vsel %vm271_vm2, %v705_v48, %v707_v27 }
 0x2f6   :  { %v715_v5 = vmul.f32 %v712_v6, %v1365_v14  ;;  %v716_v57 = vmul.f32 %v711_v8, %v1368_v15 }
 0x2f8   :  { %v723_v63 = vpop.permute.xlu0 %722  ;;  %v709_v61 = vpop.permute.xlu1 %708  ;;  %v1064_v32 = vpack.c.bf16 %v715_v5, %v699_v7  ;;  %v1082_v18 = vpack.c.bf16 %v716_v57, %v700_v0 }
 0x2f9   :  { %v710_v47 = vsel %vm271_vm2, %v707_v27, %v709_v61  ;;  %v713_v14 = vsel %vm271_vm2, %v709_v61, %v703_v58 }
 0x2fa   :  { %v714_v30 = vmul.f32 %v713_v14, %v1359_v12  ;;  %v717_v33 = vmul.f32 %v710_v47, %v1329_v54  ;;  %1065 = vmatprep.subr.bf16.mxu0 %v1064_v32 }
 0x2fc   :  { %v1066_v13 = vpack.c.bf16 %v714_v30, %v698_v46  ;;  %v735_v17 = vpop.permute.xlu0 %734  ;;  %v721_v15 = vpop.permute.xlu1 %720  ;;  %v1080_v56 = vpack.c.bf16 %v717_v33, %v701_v23 }
 0x2fd   :  { %v728_v53 = vsel %vm309_vm3, %v719_v42, %v721_v15  ;;  %v727_v6 = vsel %vm309_vm3, %v721_v15, %v723_v63 }
 0x2fe   :  { %1067 = vmatpush1.bf16.msra.mxu0 %v1066_v13  ;;  %1081 = vmatprep.subr.bf16.mxu1 %v1080_v56  ;;  %v731_v52 = vmul.f32 %v728_v53, %v1374_v19 }
 0x2ff   :  { %1083 = vmatpush1.bf16.msra.mxu1 %v1082_v18 }
 0x300   :  { %v739_v58 = vpop.permute.xlu0 %738  ;;  %v725_v49 = vpop.permute.xlu1 %724 }
 0x301   :  { %v726_v40 = vsel %vm309_vm3, %v723_v63, %v725_v49  ;;  %v729_v48 = vsel %vm309_vm3, %v725_v49, %v719_v42  ;;  %v732_v63 = vmul.f32 %v727_v6, %v1377_v20 }
 0x302   :  { %v730_v51 = vmul.f32 %v729_v48, %v1380_v21  ;;  %v733_v38 = vmul.f32 %v726_v40, %v1383_v22 }
 0x304   :  { %v751_v11 = vpop.permute.xlu0 %750  ;;  %v737_v12 = vpop.permute.xlu1 %736 }
 0x305   :  { %v744_v54 = vsel %vm347_vm4, %v735_v17, %v737_v12  ;;  %v743_v27 = vsel %vm347_vm4, %v737_v12, %v739_v58 }
 0x306   :  { %v747_v3 = vmul.f32 %v744_v54, %v1393_v25  ;;  %v748_v36 = vmul.f32 %v743_v27, %v1396_v26 }
 0x308   :  { %v755_v7 = vpop.permute.xlu0 %754  ;;  %v741_v8 = vpop.permute.xlu1 %740  ;;  %v1068_v5 = vpack.c.bf16 %v747_v3, %v731_v52  ;;  %v1086_v14 = vpack.c.bf16 %v748_v36, %v732_v63 }
 0x309   :  { %v742_v19 = vsel %vm347_vm4, %v739_v58, %v741_v8  ;;  %v745_v25 = vsel %vm347_vm4, %v741_v8, %v735_v17 }
 0x30a   :  { %v746_v42 = vmul.f32 %v745_v25, %v1400_v28  ;;  %v749_v61 = vmul.f32 %v742_v19, %v1403_v29  ;;  %1069 = vmatprep.subr.bf16.mxu0 %v1068_v5 }
 0x30c   :  { %v1070_v32 = vpack.c.bf16 %v746_v42, %v730_v51  ;;  %v767_v57 = vpop.permute.xlu0 %766  ;;  %v753_v26 = vpop.permute.xlu1 %752  ;;  %v1084_v47 = vpack.c.bf16 %v749_v61, %v733_v38 }
 0x30d   :  { %v759_v46 = vsel %vm385_vm5, %v753_v26, %v755_v7  ;;  %v760_v21 = vsel %vm385_vm5, %v751_v11, %v753_v26 }
 0x30e   :  { %v762_v22 = vmul.f32 %v760_v21, %v1411_v34  ;;  %v763_v28 = vmul.f32 %v759_v46, %v1414_v35  ;;  %1071 = vmatpush1.bf16.msra.mxu0 %v1070_v32  ;;  %1085 = vmatprep.subr.bf16.mxu1 %v1084_v47 }
 0x30f   :  { %1087 = vmatpush1.bf16.msra.mxu1 %v1086_v14 }
 0x310   :  { %v1074_v20 = vpack.c.bf16 %v762_v22, %v1588_v39  ;;  %v771_v29 = vpop.permute.xlu0 %770  ;;  %v757_v23 = vpop.permute.xlu1 %756  ;;  %v1072_v30 = vpack.c.bf16 %v763_v28, %v1596_v10 }
 0x311   :  { %v758_v33 = vsel %vm385_vm5, %v755_v7, %v757_v23  ;;  %v761_v0 = vsel %vm385_vm5, %v757_v23, %v751_v11 }
 0x312   :  { %v764_v13 = vmul.f32 %v758_v33, %v1420_v41  ;;  %v765_v34 = vmul.f32 %v761_v0, %v1423_v44  ;;  %1073 = vmatprep.subr.bf16.mxu0 %v1072_v30 }
 0x313   :  { %1075 = vmatpush1.bf16.msra.mxu0 %v1074_v20 }
 0x314   :  { %v1090_v35 = vpack.c.bf16 %v764_v13, %v1590_v16  ;;  %v783_v17 = vpop.permute.xlu0 %782  ;;  %v769_v39 = vpop.permute.xlu1 %768  ;;  %v1088_v15 = vpack.c.bf16 %v765_v34, %v1602_v9 }
 0x315   :  { %v775_v18 = vsel %vm423_vm6, %v769_v39, %v771_v29  ;;  %v776_v41 = vsel %vm423_vm6, %v767_v57, %v769_v39 }
 0x316   :  { %1089 = vmatprep.subr.bf16.mxu1 %v1088_v15  ;;  %v778_v49 = vmul.f32 %v776_v41, %v1531_v50  ;;  %v779_v9 = vmul.f32 %v775_v18, %v1450_v60 }
 0x317   :  { %1091 = vmatpush1.bf16.msra.mxu1 %v1090_v35 }
 0x318   :  { %v787_v10 = vpop.permute.xlu0 %786  ;;  %v773_v56 = vpop.permute.xlu1 %772 }
 0x319   :  { %v774_v54 = vsel %vm423_vm6, %v771_v29, %v773_v56  ;;  %v777_v52 = vsel %vm423_vm6, %v773_v56, %v767_v57 }
 0x31a   :  { %v780_v50 = vmul.f32 %v774_v54, %v1503_v37 }
 0x31c   :  { %v785_v58 = vpop.permute.xlu1 %784  ;;  %v799_v53 = vpop.permute.xlu0 %798 }
 0x31d   :  { %v791_v44 = vsel %vm461_vm7, %v785_v58, %v787_v10  ;;  %v792_v16 = vsel %vm461_vm7, %v783_v17, %v785_v58 }
 0x31e   :  { %v794_v11 = vmul.f32 %v792_v16, %v1508_v62  ;;  %v795_v12 = vmul.f32 %v791_v44, %v1523_v43  ;;  %v781_v62 = vmul.f32 %v777_v52, %v1444_v55 }
 0x320   :  { %v1078_v27 = vpack.c.bf16 %v794_v11, %v778_v49  ;;  %v789_v3 = vpop.permute.xlu1 %788  ;;  %v1076_v40 = vpack.c.bf16 %v795_v12, %v779_v9  ;;  %v803_v7 = vpop.permute.xlu0 %802 }
 0x321   :  { %v790_v48 = vsel %vm461_vm7, %v787_v10, %v789_v3  ;;  %v793_v60 = vsel %vm461_vm7, %v789_v3, %v783_v17 }
 0x322   :  { %v796_v43 = vmul.f32 %v790_v48, %v1526_v1  ;;  %v797_v6 = vmul.f32 %v793_v60, %v1511_v2  ;;  %1077 = vmatprep.subr.bf16.mxu0 %v1076_v40  ;;  %v684_v2 = vld [vmem:[%s1781_s5] sm:$0xf] }
 0x323   :  { %1079 = vmatpush1.bf16.msra.mxu0 %v1078_v27 }
 0x324   :  { %v1094_v8 = vpack.c.bf16 %v796_v43, %v780_v50  ;;  %v801_v5 = vpop.permute.xlu1 %800  ;;  %v1092_v36 = vpack.c.bf16 %v797_v6, %v781_v62 }
 0x325   :  { %v807_v19 = vsel %vm499_vm8, %v801_v5, %v803_v7  ;;  %v808_v25 = vsel %vm499_vm8, %v799_v53, %v801_v5 }
 0x326   :  { %v810_v37 = vmul.f32 %v808_v25, %v1567_v31  ;;  %v811_v55 = vmul.f32 %v807_v19, %v1561_v4  ;;  %1093 = vmatprep.subr.bf16.mxu1 %v1092_v36 }
 0x327   :  { %1095 = vmatpush1.bf16.msra.mxu1 %v1094_v8 }
 0x328   :  { %838 = vmatprep.subr.mxu0 %v811_v55  ;;  %v805_v1 = vpop.permute.xlu1 %804 }
 0x329   :  { %v806_v51 = vsel %vm499_vm8, %v803_v7, %v805_v1  ;;  %v809_v38 = vsel %vm499_vm8, %v805_v1, %v799_v53  ;;  %839 = vmatpush1.msra.mxu0 %v810_v37 }
 0x32a   :  { %v812_v42 = vmul.f32 %v806_v51, %v1564_v59  ;;  %v813_v31 = vmul.f32 %v809_v38, %v1558_v24  ;;  %997 = vmatmul.mubr.msk.f32.vlgmr.msra.gmra.mrb[4].mxu0 %vm534_vm9, %v684_v2 }
 0x32c   :  { %909 = vmatprep.subr.mxu1 %v813_v31 }
 0x32d   :  { %910 = vmatpush1.msra.mxu1 %v812_v42 }
 0x32e   :  { %998 = vmatmul.mubr.msk.f32.vlgmr.msra.gmra.mrb[4].mxu1 %vm534_vm9, %v684_v2 }
 0x331   :  { %v817_v4 = vpop.permute.xlu0 %816 }
 0x3fd   :  { %v888_v61 = vpop.f32.mrb[4].mxu0 }
 0x3fe   :  { %v889_v63 = vadd.f32 %v888_v61, %v817_v4  ;;  %v890_v32 = vpop.f32.mrb[5].mxu0 }
 0x3ff   :  { %v891_v57 = vadd.f32 %v890_v32, %v817_v4 }
 0x400   :  { %v964_v26 = vmax.f32 %v889_v63, 0.0 }
 0x401   :  { %v965_v47 = vmax.f32 %v891_v57, 0.0  ;;  %v959_v45 = vpop.f32.mrb[4].mxu1 }
 0x402   :  { %v960_v14 = vadd.f32 %v959_v45, %v817_v4  ;;  %v961_v46 = vpop.f32.mrb[5].mxu1 }
 0x403   :  { %v970_v21 = vcombine.low %v964_v26, %v965_v47  ;;  %v962_v59 = vadd.f32 %v961_v46, %v817_v4 }
 0x404   :  { %v966_v22 = vmax.f32 %v960_v14, 0.0 }
 0x405   :  { %972 = vst [vmem:[%s1782_s8] sm:$0xff] %v970_v21  ;;  %v967_v24 = vmax.f32 %v962_v59, 0.0 }
 0x407   :  { %v975_v28 = vcombine.low %v966_v22, %v967_v24 }
 0x409   :  { %999 = vst [vmem:[%s1782_s8 + $0x8] sm:$0xff] %v975_v28 }

</bundles_post_ra>
